<compile_context>
chip_gen: v7x
topology: tpu7x:2x2x1
jax: 0.10.0
libtpu: 0.0.40
codegen_flags: <defaults>
</compile_context>

<pallas_src>
import jax
import jax.numpy as jnp
from jax import lax
from jax.experimental import pallas as pl
from jax.experimental.pallas import tpu as pltpu


def _round_up(x, m):
    return -(-x // m) * m


def _onehot_lookup_kernel(ids_ref, hi_ref, lo_ref, out_ref):
    # ids_ref : (Tr, k)  int32    pre-offset one-hot column ids (token + j*Vp)
    # hi_ref  : (Kc, L)  bfloat16 block-diag fused table, high bf16 plane (Kc=k*Vp, L=k*H)
    # lo_ref  : (Kc, L)  bfloat16 low (residual) bf16 plane
    # out_ref : (Tr, L)  float32  k packed tokens per output row
    tr, k = ids_ref.shape
    kc = hi_ref.shape[0]

    ids = ids_ref[...]                                        # (Tr, k) int32
    cols = lax.broadcasted_iota(jnp.int32, (tr, kc), 1)       # (Tr, Kc)
    hit = cols == ids[:, 0:1]
    for j in range(1, k):                                     # static unroll, k <= 128//H
        hit = jnp.logical_or(hit, cols == ids[:, j:j + 1])
    onehot = jnp.where(hit, 1.0, 0.0).astype(jnp.bfloat16)    # exact in bf16

    # Two native bf16 MXU passes with f32 accumulation reconstruct the f32 table
    # values (single nonzero per row) without any precision-flag dependence.
    acc = jnp.dot(onehot, hi_ref[...], preferred_element_type=jnp.float32)
    acc = acc + jnp.dot(onehot, lo_ref[...], preferred_element_type=jnp.float32)
    out_ref[...] = acc


def multi_layer_embedding(src, emb1_weight, w2_t, *, tokens_per_tile=2048):
    """src: [B, S] int; emb1_weight: [V, D1]; w2_t: [D1, H]. Returns [B, S, H] f32."""
    B, S = src.shape
    V, D1 = emb1_weight.shape
    H = w2_t.shape[1]
    N = B * S

    # (1) Fuse Embedding -> Linear into one [V, H] table (both stages are linear).
    # TODO(synk): when D1 < H or the table exceeds the VMEM budget, gather [Tn,D1]
    # rows instead and do the [Tn,D1]x[D1,H] matmul in-kernel.
    fused = jnp.dot(emb1_weight.astype(jnp.float32), w2_t.astype(jnp.float32),
                    precision=lax.Precision.HIGHEST)          # [V, H] f32

    # (2) Output-lane packing factor: k tokens per 128-lane output row.
    if H % 128 == 0:
        k = 1                       # already lane-dense
    elif H < 128 and 128 % H == 0:
        k = 128 // H                # pack k tokens per row (L = 128)
    else:
        k = 1                       # full-array-dim block (masked stores, minimal bytes)
    L = k * H

    Vp = _round_up(V, 8)
    fused_p = jnp.pad(fused, ((0, Vp - V), (0, 0)))           # [Vp, H]
    if k > 1:
        fused_tbl = jnp.kron(jnp.eye(k, dtype=jnp.float32), fused_p)   # [k*Vp, k*H]
    else:
        fused_tbl = fused_p
    Kc = k * Vp

    # bf16 hi/lo split (hi exact in bf16; lo residual |err| <= ~2^-16 * |fused|).
    hi_f32 = fused_tbl.astype(jnp.bfloat16).astype(jnp.float32)
    tbl_hi = hi_f32.astype(jnp.bfloat16)
    tbl_lo = (fused_tbl - hi_f32).astype(jnp.bfloat16)

    # (3) Token ids -> packed (rows, k) pre-offset one-hot column indices.
    ids = jnp.clip(src.reshape(-1).astype(jnp.int32), 0, V - 1)   # clamp OOB ids
    R = _round_up(N, k) // k
    R8 = _round_up(R, 8)

    tile_rows = max(8, tokens_per_tile // k)
    Tr = min(tile_rows, R8)
    if R8 // Tr < 2 and R8 >= 16:
        Tr = _round_up(R8 // 2, 8)            # ensure >= 2 grid steps for v7x megacore

    # (4) Explicit VMEM budget; shrink the tile if needed (keeps the path v7x-safe).
    def _vmem_need(tr):
        tbl = 2 * 2 * (Kc * L * 2)            # hi+lo bf16 tables, default double-buffered
        out_b = 2 * (tr * L * 4)
        ids_b = 2 * (tr * k * 4)
        tmp = tr * Kc * 4                     # one-hot / compare temporaries (estimate)
        return tbl + out_b + ids_b + tmp

    while _vmem_need(Tr) > (48 << 20) and Tr > 8:
        Tr = max(8, _round_up(Tr // 2, 8))

    R_pad = _round_up(R8, Tr)
    grid = R_pad // Tr

    ids = jnp.pad(ids, (0, R_pad * k - N))                        # padded tokens -> row 0
    offs = (jnp.arange(k, dtype=jnp.int32) * Vp)[None, :]
    ids2d = ids.reshape(R_pad, k) + offs                          # [R_pad, k]

    vmem_limit = int(min(max(_vmem_need(Tr) + (4 << 20), 16 << 20), 64 << 20))

    cost = pl.CostEstimate(
        flops=2 * 2 * R_pad * Kc * L,                             # two MXU passes
        transcendentals=0,
        bytes_accessed=R_pad * k * 4 + 2 * Kc * L * 2 + R_pad * L * 4,
    )

    out = pl.pallas_call(
        _onehot_lookup_kernel,
        out_shape=jax.ShapeDtypeStruct((R_pad, L), jnp.float32),
        grid=(grid,),
        in_specs=[
            pl.BlockSpec((Tr, k), lambda i: (i, 0)),              # id tile (VMEM, pipelined)
            pl.BlockSpec((Kc, L), lambda i: (0, 0)),              # resident hi table
            pl.BlockSpec((Kc, L), lambda i: (0, 0)),              # resident lo table
        ],
        out_specs=pl.BlockSpec((Tr, L), lambda i: (i, 0)),
        compiler_params=pltpu.CompilerParams(
            dimension_semantics=("parallel",),                    # row tiles across TCs
            vmem_limit_bytes=vmem_limit,
        ),
        cost_estimate=cost,
    )(ids2d, tbl_hi, tbl_lo)

    # (R_pad, k*H) -> (R_pad*k, H) is a free row-major reshape; drop padded tokens.
    return out.reshape(R_pad * k, H)[:N].reshape(B, S, H)


if __name__ == "__main__":
    # Module hyperparams (small, consistent with the forward pass).
    input_dim = 16    # vocab size
    layer1_dim = 32   # first embedding dim
    hid_dim = 32      # output hidden dim
    B, S = 2, 8

    key = jax.random.PRNGKey(0)
    k_emb, k_lin, k_src = jax.random.split(key, 3)

    # nn.Embedding: weight ~ N(0, 1)
    emb1_weight = jax.random.normal(k_emb, (input_dim, layer1_dim), dtype=jnp.float32)
    # nn.Linear(bias=False): weight [hid_dim, layer1_dim] ~ U(-1/sqrt(in), 1/sqrt(in))
    bound = 1.0 / (layer1_dim ** 0.5)
    w2 = jax.random.uniform(k_lin, (hid_dim, layer1_dim), dtype=jnp.float32,
                            minval=-bound, maxval=bound)
    w2_t = w2.T  # [layer1_dim, hid_dim] so forward is x @ W^T

    src = jax.random.randint(k_src, (B, S), 0, input_dim, dtype=jnp.int32)

    out = multi_layer_embedding(src, emb1_weight, w2_t)
    out = jax.block_until_ready(out)

    # Pure-JAX reference (same semantics as the PyTorch forward: gather -> linear).
    ref = jnp.dot(jnp.take(emb1_weight, src.reshape(-1), axis=0), w2_t,
                  precision=lax.Precision.HIGHEST).reshape(B, S, hid_dim)
    assert out.shape == (B, S, hid_dim)
    err = float(jnp.max(jnp.abs(out - ref)))
    assert jnp.allclose(out, ref, atol=1e-4, rtol=1e-4), err
    print("KERNEL_OK")
</pallas_src>

<mosaic_0001>
module attributes {stable_mosaic.version = 11 : i64} {
  func.func @_onehot_lookup_kernel(%arg0: i32, %arg1: memref<8x4xi32, #tpu.memory_space<vmem>>, %arg2: memref<64x128xbf16, #tpu.memory_space<vmem>>, %arg3: memref<64x128xbf16, #tpu.memory_space<vmem>>, %arg4: memref<8x128xf32, #tpu.memory_space<vmem>>) attributes {dimension_semantics = [#tpu.dimension_semantics<parallel>], iteration_bounds = array<i64: 1>, scalar_prefetch = 0 : i64, scratch_operands = 0 : i64, tpu.core_type = #tpu.core_type<tc>, window_params = [{transform_indices = @transform_0, window_bounds = array<i64: 8, 4>}, {pipeline_mode = #tpu.pipeline_mode<synchronous>, transform_indices = @transform_1, window_bounds = array<i64: 64, 128>}, {pipeline_mode = #tpu.pipeline_mode<synchronous>, transform_indices = @transform_2, window_bounds = array<i64: 64, 128>}, {transform_indices = @transform_3, window_bounds = array<i64: 8, 128>}]} {
    %c0 = arith.constant 0 : index
    %c0_0 = arith.constant 0 : index
    %0 = vector.load %arg1[%c0, %c0_0] : memref<8x4xi32, #tpu.memory_space<vmem>>, vector<8x4xi32>
    %1 = tpu.iota {dimensions = array<i32: 1>} : vector<8x64xi32>
    %2 = vector.extract_strided_slice %0 {offsets = [0, 0], sizes = [8, 1], strides = [1, 1]} : vector<8x4xi32> to vector<8x1xi32>
    %3 = vector.broadcast %2 : vector<8x1xi32> to vector<8x64xi32>
    %4 = arith.cmpi eq, %1, %3 : vector<8x64xi32>
    %5 = vector.extract_strided_slice %0 {offsets = [0, 1], sizes = [8, 1], strides = [1, 1]} : vector<8x4xi32> to vector<8x1xi32>
    %6 = vector.broadcast %5 : vector<8x1xi32> to vector<8x64xi32>
    %7 = arith.cmpi eq, %1, %6 : vector<8x64xi32>
    %8 = arith.ori %4, %7 : vector<8x64xi1>
    %9 = vector.extract_strided_slice %0 {offsets = [0, 2], sizes = [8, 1], strides = [1, 1]} : vector<8x4xi32> to vector<8x1xi32>
    %10 = vector.broadcast %9 : vector<8x1xi32> to vector<8x64xi32>
    %11 = arith.cmpi eq, %1, %10 : vector<8x64xi32>
    %12 = arith.ori %8, %11 : vector<8x64xi1>
    %13 = vector.extract_strided_slice %0 {offsets = [0, 3], sizes = [8, 1], strides = [1, 1]} : vector<8x4xi32> to vector<8x1xi32>
    %14 = vector.broadcast %13 : vector<8x1xi32> to vector<8x64xi32>
    %15 = arith.cmpi eq, %1, %14 : vector<8x64xi32>
    %16 = arith.ori %12, %15 : vector<8x64xi1>
    %cst = arith.constant 1.000000e+00 : f32
    %cst_1 = arith.constant 0.000000e+00 : f32
    %17 = vector.broadcast %cst : f32 to vector<8x64xf32>
    %18 = vector.broadcast %cst_1 : f32 to vector<8x64xf32>
    %19 = arith.select %16, %17, %18 : vector<8x64xi1>, vector<8x64xf32>
    %20 = arith.truncf %19 : vector<8x64xf32> to vector<8x64xbf16>
    %c0_2 = arith.constant 0 : index
    %c0_3 = arith.constant 0 : index
    %21 = vector.load %arg2[%c0_2, %c0_3] : memref<64x128xbf16, #tpu.memory_space<vmem>>, vector<64x128xbf16>
    %cst_4 = arith.constant dense<0.000000e+00> : vector<8x128xf32>
    %22 = tpu.matmul %20, %21, %cst_4 {dimension_numbers = #tpu.dot_dimension_numbers<[1], [0], [0], [1], [0, 0, 1, 1], [], []>} : vector<8x64xbf16>, vector<64x128xbf16>, vector<8x128xf32> -> vector<8x128xf32>
    %c0_5 = arith.constant 0 : index
    %c0_6 = arith.constant 0 : index
    %23 = vector.load %arg3[%c0_5, %c0_6] : memref<64x128xbf16, #tpu.memory_space<vmem>>, vector<64x128xbf16>
    %cst_7 = arith.constant dense<0.000000e+00> : vector<8x128xf32>
    %24 = tpu.matmul %20, %23, %cst_7 {dimension_numbers = #tpu.dot_dimension_numbers<[1], [0], [0], [1], [0, 0, 1, 1], [], []>} : vector<8x64xbf16>, vector<64x128xbf16>, vector<8x128xf32> -> vector<8x128xf32>
    %25 = arith.addf %22, %24 : vector<8x128xf32>
    %c0_8 = arith.constant 0 : index
    %c0_9 = arith.constant 0 : index
    %26 = vector.load %arg4[%c0_8, %c0_9] : memref<8x128xf32, #tpu.memory_space<vmem>>, vector<8x128xf32>
    tpu.vector_store %arg4[%c0_8, %c0_9], %25 {strides = array<i32>} : memref<8x128xf32, #tpu.memory_space<vmem>>, vector<8x128xf32>,
    return
  }
  func.func @transform_0(%arg0: i32) -> (i32, i32) {
    %c0_i32 = arith.constant 0 : i32
    %c0_i32_0 = arith.constant 0 : i32
    return %arg0, %c0_i32 : i32, i32
  }
  func.func @transform_1(%arg0: i32) -> (i32, i32) {
    %c0_i32 = arith.constant 0 : i32
    %c0_i32_0 = arith.constant 0 : i32
    %c0_i32_1 = arith.constant 0 : i32
    return %c0_i32, %c0_i32_0 : i32, i32
  }
  func.func @transform_2(%arg0: i32) -> (i32, i32) {
    %c0_i32 = arith.constant 0 : i32
    %c0_i32_0 = arith.constant 0 : i32
    %c0_i32_1 = arith.constant 0 : i32
    return %c0_i32, %c0_i32_0 : i32, i32
  }
  func.func @transform_3(%arg0: i32) -> (i32, i32) {
    %c0_i32 = arith.constant 0 : i32
    %c0_i32_0 = arith.constant 0 : i32
    return %arg0, %c0_i32 : i32, i32
  }
}

</mosaic_0001>

<bundles_post_ra>
// kernel: tpu_custom_call.1
= control target key start
LH: loop header
LB: loop body
LE: loop exit
PB: predicated region body
PF: predicated region fallthrough
CT: control target
= control target key end

     0   :  { %8 = vsyncpa [#allocation3], 0  ;;  %s444_s0 = inlined_call_operand.vmem [shape: s32[8,4], index: 0, kind: input, shape index: {}]   ;;  %s445_s1 = inlined_call_operand.hbm [shape: bf16[64,128], index: 1, kind: input, shape index: {}]   ;;  %s446_s2 = inlined_call_operand.hbm [shape: bf16[64,128], index: 2, kind: input, shape index: {}]   ;;  %s447_s3 = inlined_call_operand.hbm [shape: f32[8,128], index: 3, kind: output, shape index: {}]  }
   0x1   :  { %9 = vsyncpa [#allocation6], 0 }
   0x2   :  { %10 = vsyncpa [#allocation4], 0  ;;  %s374_s12 = smov [#allocation2]   ;;  %s302_s16 = scalar_lea.hbm %s445_s1, 512 }
   0x3   :  { %s18_s13 = sshll.u32 %s374_s12, 4  ;;  %p303_p0 = scmp.ne.s32.totalorder %s445_s1, %s302_s16  ;;  %s19_s13 = int_to_ptr.vmem [resolvable:$true] %s18_s13 }
   0x4   :  { %p306_p1 = scmp.lt.u32.totalorder %s302_s16, %s445_s1 }
   0x6   :  { %p308_p2 = pnand %p306_p1, %p303_p0 }
   0x8   :  { %311 = shalt.err (!%p308_p2)
}
   0x9   :  { %s312_s21 = scalar_lea.vmem %s19_s13, 512  ;;  %p317_p4 = scmp.lt.s32.totalorder %s19_s13, %s19_s13 }
   0xa   :  { %p313_p3 = scmp.ne.s32.totalorder %s19_s13, %s312_s21  ;;  %p318_p5 = scmp.lt.s32.totalorder %s312_s21, %s312_s21 }
   0xc   :  { %p319_p6 = por %p318_p5, %p317_p4 }
   0xe   :  { %p320_p7 = pnand %p319_p6, %p313_p3 }
  0x10   :  { %323 = shalt.err (!%p320_p7)
}
  0x11   :  { %s375_s22 = smov 64   ;;  %s376_s23 = smov 4  }
  0x12   :  { %24 = dma.hbm_to_vmem [thread:$0]  %s445_s1, 512, %s19_s13, [#allocation3], %s375_s22, %s375_s22, %s376_s23  }
  0x13   :  { %s377_s26 = smov [#allocation5]   ;;  %s324_s30 = scalar_lea.hbm %s446_s2, 512 }
  0x14   :  { %s30_s27 = sshll.u32 %s377_s26, 4  ;;  %p325_p8 = scmp.ne.s32.totalorder %s446_s2, %s324_s30  ;;  %s31_s27 = int_to_ptr.vmem [resolvable:$true] %s30_s27 }
  0x15   :  { %p328_p9 = scmp.lt.u32.totalorder %s324_s30, %s446_s2 }
  0x17   :  { %p330_p10 = pnand %p328_p9, %p325_p8 }
  0x19   :  { %333 = shalt.err (!%p330_p10)
}
  0x1a   :  { %s334_s8 = scalar_lea.vmem %s31_s27, 512  ;;  %p339_p12 = scmp.lt.s32.totalorder %s31_s27, %s31_s27 }
  0x1b   :  { %p335_p11 = scmp.ne.s32.totalorder %s31_s27, %s334_s8  ;;  %p340_p13 = scmp.lt.s32.totalorder %s334_s8, %s334_s8 }
  0x1d   :  { %p341_p0 = por %p340_p13, %p339_p12 }
  0x1f   :  { %p342_p1 = pnand %p341_p0, %p335_p11 }
  0x21   :  { %345 = shalt.err (!%p342_p1)
}
  0x22   :  { %36 = dma.hbm_to_vmem [thread:$0]  %s446_s2, 512, %s31_s27, [#allocation6], %s375_s22, %s375_s22, %s376_s23  }
  0x23   :  { %368 = dma.done.wait [#allocation3], 512  }
  0x24   :  { %369 = vsyncadd [#allocation3], 4294966784 }
  0x25   :  { %370 = dma.done.wait [#allocation6], 512  }
  0x26   :  { %371 = vsyncadd [#allocation6], 4294966784  ;;  %v378_v0 = vmov 0   ;;  %v379_v1 = vmov 2   ;;  %v380_v2 = vmov 0.0   ;;  %v44_v3 = vld [vmem:[%s444_s0] sm:$0xff]  ;;  %v45_v14 = vlaneseq }
  0x27   :  { %289 = vset.pattern.permute.xlu0 %v378_v0  ;;  %291 = vset.pattern.permute.xlu1 %v379_v1  ;;  %v294_v4 = vld [vmem:[#allocation5] sm:$0xff]   ;;  %v296_v6 = vld [vmem:[#allocation5 + $0x8] sm:$0xff]   ;;  %v381_v8 = vmov 1   ;;  %v382_v9 = vmov 3   ;;  %v298_v10 = vld [vmem:[#allocation5 + $0x10] sm:$0xff]   ;;  %vm383_vm0 = vmmov 0  }
  0x28   :  { %253 = vmatprep.subr.bf16.mxu1 %v380_v2  ;;  %265 = vmatprep.subr.bf16.mxu0 %v380_v2  ;;  %v295_v5 = vld [vmem:[#allocation2] sm:$0xff]   ;;  %v297_v7 = vld [vmem:[#allocation2 + $0x8] sm:$0xff]   ;;  %v299_v11 = vld [vmem:[#allocation2 + $0x10] sm:$0xff]   ;;  %v46_v17 = vand.u32 127, %v45_v14  ;;  %vm108_vm8 = vcmask 523264   ;;  %s384_s0 = smov [#allocation7]  }
  0x29   :  { %48 = vperm.xlu0 %289, %v44_v3   ;;  %57 = vperm.xlu1 %291, %v44_v3   ;;  %v300_v12 = vld [vmem:[#allocation5 + $0x18] sm:$0xff]   ;;  %s223_s2 = sshll.u32 %s384_s0, 4  ;;  %s224_s2 = int_to_ptr.vmem [resolvable:$true] %s223_s2 }
  0x2a   :  { %254 = vmatpush3.bf16.msra.mxu1 %v294_v4  ;;  %266 = vmatpush3.bf16.msra.mxu0 %v295_v5  ;;  %v301_v13 = vld [vmem:[#allocation2 + $0x18] sm:$0xff]   ;;  %s346_s12 = scalar_lea.vmem %s224_s2, 128  ;;  %p351_p3 = scmp.lt.s32.totalorder %s224_s2, %s224_s2 }
  0x2b   :  { %255 = vmatprep.subr.bf16.mxu1 %v380_v2  ;;  %267 = vmatprep.subr.bf16.mxu0 %v380_v2  ;;  %p347_p2 = scmp.ne.s32.totalorder %s224_s2, %s346_s12  ;;  %p352_p4 = scmp.lt.s32.totalorder %s346_s12, %s346_s12 }
  0x2c   :  { %261 = vmatprep.mubr.msk.bf16.mxu1 %vm383_vm0, %v380_v2  ;;  %273 = vmatprep.mubr.msk.bf16.mxu0 %vm383_vm0, %v380_v2 }
  0x2d   :  { %290 = vset.pattern.permute.xlu0 %v381_v8  ;;  %292 = vset.pattern.permute.xlu1 %v382_v9  ;;  %p353_p5 = por %p352_p4, %p351_p3 }
  0x2e   :  { %52 = vperm.xlu0 %290, %v44_v3   ;;  %62 = vperm.xlu1 %292, %v44_v3  }
  0x2f   :  { %256 = vmatpush3.bf16.msra.mxu1 %v296_v6  ;;  %268 = vmatpush3.bf16.msra.mxu0 %v297_v7  ;;  %p354_p6 = pnand %p353_p5, %p347_p2 }
  0x30   :  { %257 = vmatprep.subr.bf16.mxu1 %v380_v2  ;;  %269 = vmatprep.subr.bf16.mxu0 %v380_v2 }
  0x32   :  { %293 = vset.pattern.permute.xlu0 %v382_v9 }
  0x33   :  { %258 = vmatpush3.bf16.msra.mxu1 %v298_v10  ;;  %270 = vmatpush3.bf16.msra.mxu0 %v299_v11 }
  0x34   :  { %259 = vmatprep.subr.bf16.mxu1 %v380_v2  ;;  %271 = vmatprep.subr.bf16.mxu0 %v380_v2 }
  0x37   :  { %260 = vmatpush3.bf16.msra.mxu1 %v300_v12  ;;  %272 = vmatpush3.bf16.msra.mxu0 %v301_v13 }
  0xa8   :  { %v49_v15 = vpop.permute.xlu0 %48  ;;  %v58_v16 = vpop.permute.xlu1 %57 }
  0xa9   :  { %vm50_vm1 = vcmp.eq.s32.totalorder %v46_v17, %v49_v15  ;;  %vm59_vm4 = vcmp.eq.s32.totalorder %v46_v17, %v58_v16 }
  0xad   :  { %v53_v18 = vpop.permute.xlu0 %52  ;;  %v63_v19 = vpop.permute.xlu1 %62 }
  0xae   :  { %vm54_vm2 = vcmp.eq.s32.totalorder %v46_v17, %v53_v18  ;;  %vm64_vm3 = vcmp.eq.s32.totalorder %v46_v17, %v63_v19 }
  0xaf   :  { %vm55_vm5 = vmor %vm50_vm1, %vm54_vm2 }
  0xb0   :  { %vm60_vm6 = vmor %vm55_vm5, %vm59_vm4 }
  0xb1   :  { %vm65_vm7 = vmor %vm60_vm6, %vm64_vm3 }
  0xb2   :  { %v66_v20 = vsel %vm65_vm7, 1.0, %v380_v2 }
  0xb3   :  { %v67_v21 = vpack.c.bf16 %v66_v20, %v66_v20 }
  0xb5   :  { %262 = vmatmul.mubr.msk.bf16.vlgmr.msra.gmra.mrb[0].mxu1 %vm108_vm8, %v67_v21  ;;  %274 = vmatmul.mubr.msk.bf16.vlgmr.msra.gmra.mrb[0].mxu0 %vm108_vm8, %v67_v21 }
 0x188   :  { %v146_v22 = vpop.f32.mrb[0].mxu1  ;;  %v210_v23 = vpop.f32.mrb[0].mxu0 }
 0x189   :  { %v211_v24 = vadd.f32 %v210_v23, %v146_v22  ;;  %v263_v25 = vpop.f32.mrb[1].mxu1  ;;  %v275_v26 = vpop.f32.mrb[1].mxu0 }
 0x18a   :  { %v149_v27 = vpop.f32.mrb[2].mxu1  ;;  %v213_v28 = vpop.f32.mrb[2].mxu0 }
 0x18b   :  { %216 = vst [vmem:[#allocation7] sm:$0xff] %v211_v24  ;;  %v264_v29 = vpop.f32.mrb[3].mxu1  ;;  %v276_v30 = vpop.f32.mrb[3].mxu0 }
 0x18c   :  { %357 = shalt.err (!%p354_p6)
}
 0x18d   :  { %s358_s15 = scalar_lea.hbm %s447_s3, 128 }
 0x18e   :  { %p359_p7 = scmp.ne.s32.totalorder %s447_s3, %s358_s15  ;;  %p362_p8 = scmp.lt.u32.totalorder %s358_s15, %s447_s3 }
 0x190   :  { %p364_p9 = pnand %p362_p8, %p359_p7 }
 0x192   :  { %367 = shalt.err (!%p364_p9)
}
 0x193   :  { %226 = dma.vmem_to_hbm [thread:$0]  %s224_s2, 128, %s447_s3, [#allocation4]  }
 0x194   :  { %372 = dma.done.wait [#allocation4], 128  }
 0x195   :  { %373 = vsyncadd [#allocation4], 4294967168 }
 0x196   :  { %230 = vsyncpa [#allocation3], 1 }
 0x197   :  { %231 = vsyncpa [#allocation6], 1 }
 0x198   :  { %232 = vsyncpa [#allocation4], 1 }

</bundles_post_ra>
